<compile_context>
chip_gen: v6e
topology: v6e:2x2x1
jax: 0.10.0
libtpu: 0.0.40
codegen_flags: <defaults>
</compile_context>

<pallas_src>
import functools

import jax
import jax.numpy as jnp
from jax.experimental import pallas as pl
from jax.experimental.pallas import tpu as pltpu

EPS = 1e-3


# ---------------- generation-aware VMEM budgeting ----------------

def _physical_vmem_bytes():
    try:
        info = pltpu.get_tpu_info()
        for attr in ("vmem_capacity_bytes", "vmem_bytes", "vmem_size_bytes"):
            v = getattr(info, attr, None)
            if isinstance(v, int) and v > 0:
                return v
    except Exception:
        pass
    return 64 << 20  # conservative (v7x-sized) default if query fails


def _vmem_limit_bytes(block_bytes, clamp):
    return int(min(max(block_bytes * 3 // 2 + (2 << 20), 16 << 20), clamp))


def _block_bytes(ct, nt, hwt, itemsize):
    # input block + output block, each double-buffered by the pipeline,
    # plus the in-kernel f32 upcast working copy for sub-f32 dtypes.
    io = 4 * nt * ct * hwt * itemsize
    f32_tmp = nt * ct * hwt * 4 if itemsize < 4 else 0
    return io + f32_tmp


# ---------------- tile selection ----------------

def _min_c_tile(itemsize):
    # c_tile is the sublane dim of the block: 8 rows/f32, 16/bf16, 32/8-bit.
    return {4: 8, 2: 16, 1: 32}.get(itemsize, 8)


def _c_tile_candidates(C, min_ct):
    divs = [d for d in range(min_ct, C + 1)
            if C % d == 0 and (d % 8 == 0 or d == C)]
    return divs or [C]


def _resident_c_tile(C, min_ct, fits):
    """Largest fitting channel tile that still gives >= 4 grid steps; else the
    largest fitting tile; else None (-> two-pass fallback)."""
    best = None
    for d in reversed(_c_tile_candidates(C, min_ct)):
        if not fits(d):
            continue
        if best is None:
            best = d
        if C // d >= 4:
            return d
    return best


def _fallback_tiles(N, C, HW, itemsize, budget, min_ct):
    c_divs = _c_tile_candidates(C, min_ct)
    # Prefer full HW (single reduction chunk in HW) with as many batch rows as fit.
    for ct in reversed(c_divs):
        unit = _block_bytes(ct, 1, HW, itemsize)
        if unit <= budget:
            nt = int(max(1, min(N, budget // unit)))
            return ct, nt, HW
    # Otherwise tile H*W in lane-aligned (multiple-of-128) chunks.
    ct = c_divs[0]
    if HW <= 128:
        return ct, 1, HW
    unit = _block_bytes(ct, 1, 128, itemsize)
    chunks = max(1, budget // max(unit, 1))
    hwt = int(min(chunks * 128, HW))
    if hwt < HW:
        hwt = max((hwt // 128) * 128, 128)
    return ct, 1, hwt


def _maybe_buffered_spec(block_shape, index_map, small):
    # 3-deep pipelining only for small blocks (hides DMA latency); keep the
    # default double buffer for large blocks to save VMEM.
    if small:
        try:
            return pl.BlockSpec(block_shape, index_map,
                                pipeline_mode=pl.Buffered(3))
        except Exception:
            pass
    return pl.BlockSpec(block_shape, index_map)


# ---------------- resident path: whole (N, H*W) reduction stays in VMEM ----------------

def _bn_relu_resident_kernel(x_ref, gamma_ref, beta_ref, o_ref):
    # x_ref: (N, C_TILE, HW); gamma_ref / beta_ref: (C_TILE, 1) per-tile blocks.
    x = x_ref[...].astype(jnp.float32)
    inv_n = 1.0 / (x.shape[0] * x.shape[2])
    # Single fused traversal: sum and sum-of-squares together.
    s = jnp.sum(jnp.sum(x, axis=2, keepdims=True), axis=0, keepdims=True)
    sq = jnp.sum(jnp.sum(x * x, axis=2, keepdims=True), axis=0, keepdims=True)
    mean = s * inv_n
    var = jnp.maximum(sq * inv_n - mean * mean, 0.0)
    inv_std = jax.lax.rsqrt(var + EPS)

    scale = inv_std * gamma_ref[...].astype(jnp.float32)[None]   # (1, C_TILE, 1)
    shift = beta_ref[...].astype(jnp.float32)[None] - mean * scale
    # Re-index x_ref for the apply pass so the f32 upcast copy need not stay live.
    o_ref[...] = jnp.maximum(
        x_ref[...].astype(jnp.float32) * scale + shift, 0.0).astype(o_ref.dtype)


def _bn_relu_resident(x3, gamma2, beta2, c_tile, block_bytes, vmem_clamp):
    N, C, HW = x3.shape
    return pl.pallas_call(
        _bn_relu_resident_kernel,
        out_shape=jax.ShapeDtypeStruct((N, C, HW), x3.dtype),
        grid_spec=pltpu.PrefetchScalarGridSpec(
            num_scalar_prefetch=0,
            grid=(C // c_tile,),
            in_specs=[
                pl.BlockSpec((N, c_tile, HW), lambda i: (0, i, 0)),
                pl.BlockSpec((c_tile, 1), lambda i: (i, 0)),
                pl.BlockSpec((c_tile, 1), lambda i: (i, 0)),
            ],
            out_specs=pl.BlockSpec((N, c_tile, HW), lambda i: (0, i, 0)),
        ),
        compiler_params=pltpu.CompilerParams(
            dimension_semantics=("parallel",),
            vmem_limit_bytes=_vmem_limit_bytes(block_bytes, vmem_clamp),
        ),
    )(x3, gamma2, beta2)


# ---------------- two-pass fallback for activations that don't fit VMEM ----------------

def _bn_stats_kernel(x_ref, sum_ref, sumsq_ref, *, n_total, hw_total,
                     mask_n, mask_hw):
    # x_ref: (N_TILE, C_TILE, HW_TILE); accumulate over the last two
    # ("arbitrary") grid axes.  Tail blocks are masked when tiles don't divide.
    nt, ct, hwt = x_ref.shape
    x = x_ref[...].astype(jnp.float32)
    if mask_n or mask_hw:
        valid = None
        if mask_n:
            n0 = pl.program_id(1) * nt
            valid = (jax.lax.broadcasted_iota(jnp.int32, (nt, ct, hwt), 0)
                     + n0) < n_total
        if mask_hw:
            h0 = pl.program_id(2) * hwt
            vh = (jax.lax.broadcasted_iota(jnp.int32, (nt, ct, hwt), 2)
                  + h0) < hw_total
            valid = vh if valid is None else jnp.logical_and(valid, vh)
        x = jnp.where(valid, x, 0.0)

    s = jnp.sum(jnp.sum(x, axis=2, keepdims=True), axis=0)        # (C_TILE, 1)
    sq = jnp.sum(jnp.sum(x * x, axis=2, keepdims=True), axis=0)   # (C_TILE, 1)

    @pl.when(jnp.logical_and(pl.program_id(1) == 0, pl.program_id(2) == 0))
    def _():
        sum_ref[...] = jnp.zeros_like(sum_ref)
        sumsq_ref[...] = jnp.zeros_like(sumsq_ref)

    sum_ref[...] += s
    sumsq_ref[...] += sq


def _bn_apply_kernel(x_ref, scale_ref, shift_ref, o_ref):
    x = x_ref[...].astype(jnp.float32)
    scale = scale_ref[...][None]   # (1, C_TILE, 1)
    shift = shift_ref[...][None]
    o_ref[...] = jnp.maximum(x * scale + shift, 0.0).astype(o_ref.dtype)


def _bn_relu_two_pass(x3, gamma2, beta2, c_tile, n_tile, hw_tile,
                      block_bytes, vmem_clamp):
    N, C, HW = x3.shape
    itemsize = jnp.dtype(x3.dtype).itemsize
    grid = (C // c_tile, pl.cdiv(N, n_tile), pl.cdiv(HW, hw_tile))
    mask_n = (N % n_tile) != 0
    mask_hw = (HW % hw_tile) != 0
    small = n_tile * c_tile * hw_tile * itemsize < (1 << 20)

    x_spec = _maybe_buffered_spec((n_tile, c_tile, hw_tile),
                                  lambda c, n, h: (n, c, h), small)
    vlim = _vmem_limit_bytes(block_bytes, vmem_clamp)

    sums, sumsqs = pl.pallas_call(
        functools.partial(_bn_stats_kernel, n_total=N, hw_total=HW,
                          mask_n=mask_n, mask_hw=mask_hw),
        out_shape=(jax.ShapeDtypeStruct((C, 1), jnp.float32),
                   jax.ShapeDtypeStruct((C, 1), jnp.float32)),
        grid_spec=pltpu.PrefetchScalarGridSpec(
            num_scalar_prefetch=0,
            grid=grid,
            in_specs=[x_spec],
            out_specs=(pl.BlockSpec((c_tile, 1), lambda c, n, h: (c, 0)),
                       pl.BlockSpec((c_tile, 1), lambda c, n, h: (c, 0))),
        ),
        compiler_params=pltpu.CompilerParams(
            dimension_semantics=("parallel", "arbitrary", "arbitrary"),
            vmem_limit_bytes=vlim,
        ),
    )(x3)

    # Tiny (C, 1) epilogue between the passes (negligible XLA op).
    cnt = jnp.float32(N * HW)
    mean = sums / cnt
    var = jnp.maximum(sumsqs / cnt - mean * mean, 0.0)
    inv_std = jax.lax.rsqrt(var + EPS)
    scale = gamma2.astype(jnp.float32) * inv_std
    shift = beta2.astype(jnp.float32) - mean * scale

    return pl.pallas_call(
        _bn_apply_kernel,
        out_shape=jax.ShapeDtypeStruct(x3.shape, x3.dtype),
        grid_spec=pltpu.PrefetchScalarGridSpec(
            num_scalar_prefetch=0,
            grid=grid,
            in_specs=[x_spec,
                      pl.BlockSpec((c_tile, 1), lambda c, n, h: (c, 0)),
                      pl.BlockSpec((c_tile, 1), lambda c, n, h: (c, 0))],
            out_specs=pl.BlockSpec((n_tile, c_tile, hw_tile),
                                   lambda c, n, h: (n, c, h)),
        ),
        compiler_params=pltpu.CompilerParams(
            dimension_semantics=("parallel", "parallel", "parallel"),
            vmem_limit_bytes=vlim,
        ),
    )(x3, scale, shift)


# ---------------- public wrapper ----------------

def batchnorm_relu(x_nchw, gamma, beta, *, vmem_budget_bytes=None):
    N, C, H, W = x_nchw.shape
    HW = H * W
    itemsize = jnp.dtype(x_nchw.dtype).itemsize
    min_ct = _min_c_tile(itemsize)

    phys = _physical_vmem_bytes()
    clamp = int(max(min(phys - (8 << 20), 7 * phys // 8), 16 << 20))
    budget = int(3 * phys // 4) if vmem_budget_bytes is None else int(vmem_budget_bytes)
    budget = min(budget, clamp)

    # Free reshapes only (no transpose => no extra HBM passes).
    x3 = x_nchw.reshape(N, C, HW)
    gamma2 = gamma.reshape(C, 1)
    beta2 = beta.reshape(C, 1)

    fits = lambda ct: _block_bytes(ct, N, HW, itemsize) <= budget
    c_tile = _resident_c_tile(C, min_ct, fits)

    if c_tile is not None:
        out3 = _bn_relu_resident(
            x3, gamma2, beta2, c_tile,
            _block_bytes(c_tile, N, HW, itemsize), clamp)
    else:
        ct, nt, hwt = _fallback_tiles(N, C, HW, itemsize, budget, min_ct)
        out3 = _bn_relu_two_pass(
            x3, gamma2, beta2, ct, nt, hwt,
            _block_bytes(ct, nt, hwt, itemsize), clamp)

    return out3.reshape(N, C, H, W)


def batchnorm_relu_ref(x_nchw, gamma, beta):
    x = x_nchw.astype(jnp.float32)
    mean = jnp.mean(x, axis=(0, 2, 3), keepdims=True)
    var = jnp.var(x, axis=(0, 2, 3), keepdims=True)
    y = (x - mean) * jax.lax.rsqrt(var + EPS)
    y = y * gamma.reshape(1, -1, 1, 1) + beta.reshape(1, -1, 1, 1)
    return jnp.maximum(y, 0.0)


# TODO(synk): running_mean / running_var buffer updates (momentum=0.1 side
# effect of BatchNorm2d in training mode) are not materialized; they do not
# affect the returned tensor.

if __name__ == "__main__":
    key = jax.random.PRNGKey(0)
    kx, kg, kb = jax.random.split(key, 3)
    C = 64
    # Deterministic, nontrivial affine params (PyTorch default would be ones/zeros).
    gamma = 1.0 + 0.1 * jax.random.normal(kg, (C,), dtype=jnp.float32)
    beta = 0.1 * jax.random.normal(kb, (C,), dtype=jnp.float32)

    def check(shape, dtype, budget, tol):
        xk = jax.random.normal(kx, shape, dtype=jnp.float32).astype(dtype)
        ref = batchnorm_relu_ref(xk.astype(jnp.float32), gamma, beta)
        out = jax.block_until_ready(
            batchnorm_relu(xk, gamma, beta, vmem_budget_bytes=budget))
        assert out.shape == shape
        err = jnp.max(jnp.abs(out.astype(jnp.float32) - ref))
        assert err < tol, f"mismatch {float(err)} for {shape} {dtype} budget={budget}"

    # Resident (single-pass) path, small shape.
    check((2, C, 16, 16), jnp.float32, None, 1e-4)
    # Resident path at the original module's shape (1, 64, 56, 56).
    check((1, C, 56, 56), jnp.float32, None, 1e-4)
    # Resident path, bf16 (exercises dtype-aware tiling + f32 accounting).
    check((2, C, 16, 16), jnp.bfloat16, None, 5e-2)
    # Two-pass fallback (forced via tiny VMEM budget), tiles divide evenly.
    check((2, C, 16, 16), jnp.float32, 32 * 1024, 1e-4)
    # Two-pass fallback with H*W tiling and masked tail (HW=196, tile=128).
    check((3, C, 14, 14), jnp.float32, 24 * 1024, 1e-4)

    print("KERNEL_OK")
</pallas_src>

<mosaic_0001>
module attributes {stable_mosaic.version = 11 : i64} {
  func.func @_bn_relu_resident_kernel(%arg0: i32, %arg1: memref<2x16x256xf32, #tpu.memory_space<vmem>>, %arg2: memref<16x1xf32, #tpu.memory_space<vmem>>, %arg3: memref<16x1xf32, #tpu.memory_space<vmem>>, %arg4: memref<2x16x256xf32, #tpu.memory_space<vmem>>) attributes {dimension_semantics = [#tpu.dimension_semantics<parallel>], iteration_bounds = array<i64: 4>, scalar_prefetch = 0 : i64, scratch_operands = 0 : i64, tpu.core_type = #tpu.core_type<tc>, window_params = [{transform_indices = @transform_0, window_bounds = array<i64: 2, 16, 256>}, {transform_indices = @transform_1, window_bounds = array<i64: 16, 1>}, {transform_indices = @transform_2, window_bounds = array<i64: 16, 1>}, {transform_indices = @transform_3, window_bounds = array<i64: 2, 16, 256>}]} {
    %c0 = arith.constant 0 : index
    %c0_0 = arith.constant 0 : index
    %c0_1 = arith.constant 0 : index
    %0 = vector.load %arg1[%c0, %c0_0, %c0_1] : memref<2x16x256xf32, #tpu.memory_space<vmem>>, vector<2x16x256xf32>
    %cst = arith.constant dense<0.000000e+00> : vector<2x16xf32>
    %1 = vector.multi_reduction <add>, %0, %cst [2] : vector<2x16x256xf32> to vector<2x16xf32>
    %2 = vector.shape_cast %1 : vector<2x16xf32> to vector<2x16x1xf32>
    %cst_2 = arith.constant dense<0.000000e+00> : vector<16x1xf32>
    %3 = vector.multi_reduction <add>, %2, %cst_2 [0] : vector<2x16x1xf32> to vector<16x1xf32>
    %4 = vector.shape_cast %3 : vector<16x1xf32> to vector<1x16x1xf32>
    %5 = arith.mulf %0, %0 : vector<2x16x256xf32>
    %cst_3 = arith.constant dense<0.000000e+00> : vector<2x16xf32>
    %6 = vector.multi_reduction <add>, %5, %cst_3 [2] : vector<2x16x256xf32> to vector<2x16xf32>
    %7 = vector.shape_cast %6 : vector<2x16xf32> to vector<2x16x1xf32>
    %cst_4 = arith.constant dense<0.000000e+00> : vector<16x1xf32>
    %8 = vector.multi_reduction <add>, %7, %cst_4 [0] : vector<2x16x1xf32> to vector<16x1xf32>
    %9 = vector.shape_cast %8 : vector<16x1xf32> to vector<1x16x1xf32>
    %cst_5 = arith.constant 0.001953125 : f32
    %10 = vector.broadcast %cst_5 : f32 to vector<1x16x1xf32>
    %11 = arith.mulf %4, %10 : vector<1x16x1xf32>
    %cst_6 = arith.constant 0.001953125 : f32
    %12 = vector.broadcast %cst_6 : f32 to vector<1x16x1xf32>
    %13 = arith.mulf %9, %12 : vector<1x16x1xf32>
    %14 = arith.mulf %11, %11 : vector<1x16x1xf32>
    %15 = arith.subf %13, %14 : vector<1x16x1xf32>
    %cst_7 = arith.constant 0.000000e+00 : f32
    %16 = vector.broadcast %cst_7 : f32 to vector<1x16x1xf32>
    %17 = arith.maximumf %15, %16 : vector<1x16x1xf32>
    %cst_8 = arith.constant 1.000000e-03 : f32
    %18 = vector.broadcast %cst_8 : f32 to vector<1x16x1xf32>
    %19 = arith.addf %17, %18 : vector<1x16x1xf32>
    %20 = math.rsqrt %19 : vector<1x16x1xf32>
    %c0_9 = arith.constant 0 : index
    %c0_10 = arith.constant 0 : index
    %21 = vector.load %arg2[%c0_9, %c0_10] : memref<16x1xf32, #tpu.memory_space<vmem>>, vector<16x1xf32>
    %22 = vector.shape_cast %21 : vector<16x1xf32> to vector<1x16x1xf32>
    %23 = arith.mulf %20, %22 : vector<1x16x1xf32>
    %c0_11 = arith.constant 0 : index
    %c0_12 = arith.constant 0 : index
    %24 = vector.load %arg3[%c0_11, %c0_12] : memref<16x1xf32, #tpu.memory_space<vmem>>, vector<16x1xf32>
    %25 = vector.shape_cast %24 : vector<16x1xf32> to vector<1x16x1xf32>
    %26 = arith.mulf %11, %23 : vector<1x16x1xf32>
    %27 = arith.subf %25, %26 : vector<1x16x1xf32>
    %c0_13 = arith.constant 0 : index
    %c0_14 = arith.constant 0 : index
    %c0_15 = arith.constant 0 : index
    %28 = vector.load %arg1[%c0_13, %c0_14, %c0_15] : memref<2x16x256xf32, #tpu.memory_space<vmem>>, vector<2x16x256xf32>
    %29 = vector.broadcast %23 : vector<1x16x1xf32> to vector<2x16x256xf32>
    %30 = arith.mulf %28, %29 : vector<2x16x256xf32>
    %31 = vector.broadcast %27 : vector<1x16x1xf32> to vector<2x16x256xf32>
    %32 = arith.addf %30, %31 : vector<2x16x256xf32>
    %cst_16 = arith.constant 0.000000e+00 : f32
    %33 = vector.broadcast %cst_16 : f32 to vector<2x16x256xf32>
    %34 = arith.maximumf %32, %33 : vector<2x16x256xf32>
    %c0_17 = arith.constant 0 : index
    %c0_18 = arith.constant 0 : index
    %c0_19 = arith.constant 0 : index
    %35 = vector.load %arg4[%c0_17, %c0_18, %c0_19] : memref<2x16x256xf32, #tpu.memory_space<vmem>>, vector<2x16x256xf32>
    tpu.vector_store %arg4[%c0_17, %c0_18, %c0_19], %34 {strides = array<i32>} : memref<2x16x256xf32, #tpu.memory_space<vmem>>, vector<2x16x256xf32>,
    return
  }
  func.func @transform_0(%arg0: i32) -> (i32, i32, i32) {
    %c0_i32 = arith.constant 0 : i32
    %c0_i32_0 = arith.constant 0 : i32
    %c0_i32_1 = arith.constant 0 : i32
    return %c0_i32, %arg0, %c0_i32_0 : i32, i32, i32
  }
  func.func @transform_1(%arg0: i32) -> (i32, i32) {
    %c0_i32 = arith.constant 0 : i32
    %c0_i32_0 = arith.constant 0 : i32
    return %arg0, %c0_i32 : i32, i32
  }
  func.func @transform_2(%arg0: i32) -> (i32, i32) {
    %c0_i32 = arith.constant 0 : i32
    %c0_i32_0 = arith.constant 0 : i32
    return %arg0, %c0_i32 : i32, i32
  }
  func.func @transform_3(%arg0: i32) -> (i32, i32, i32) {
    %c0_i32 = arith.constant 0 : i32
    %c0_i32_0 = arith.constant 0 : i32
    %c0_i32_1 = arith.constant 0 : i32
    return %c0_i32, %arg0, %c0_i32_0 : i32, i32, i32
  }
}

</mosaic_0001>

<bundles_post_ra>
// kernel: tpu_custom_call.1
= control target key start
LH: loop header
LB: loop body
LE: loop exit
PB: predicated region body
PF: predicated region fallthrough
CT: control target
= control target key end

     0   :  { %8 = vsyncpa [#allocation3], 0  ;;  %s874_s0 = inlined_call_operand.hbm [shape: f32[2,64,256], index: 0, kind: input, shape index: {}]   ;;  %s875_s1 = inlined_call_operand.vmem [shape: f32[64,1], index: 1, kind: input, shape index: {}]   ;;  %s876_s2 = inlined_call_operand.vmem [shape: f32[64,1], index: 2, kind: input, shape index: {}]   ;;  %s877_s3 = inlined_call_operand.hbm [shape: f32[2,64,256], index: 3, kind: output, shape index: {}]  }
   0x1   :  { %10 = vsyncpa [#allocation3 + $0x1], 0 }
   0x2   :  { %11 = vsyncpa [#allocation4], 0 }
   0x3   :  { %13 = vsyncpa [#allocation4 + $0x1], 0  ;;  %s690_s12 = smov 0   ;;  %s692_s13 = smov 0  }
   0x4   :  { %s694_s14 = smov 0   ;;  %s696_s15 = smov 0  }
   0x5 LB: > { %s711_s16 = sadd.s32 4294967295, %s654_s15   ;;  %s516_s17 = sadd.s32 4294967294, %s654_s15   ;;  %s654_s15 = sphi %s696_s15, %s885_s15   ;;  %s650_s14 = sphi %s694_s14, %s884_s14   ;;  %s646_s13 = sphi %s692_s13, %s883_s13   ;;  %s642_s12 = sphi %s690_s12, %s882_s12  }
   0x6   : > { %s715_s18 = sadd.s32 1, %s654_s15   ;;  %s26_s19 = sadd.s32 1, %s650_s14 }
   0x7   : > { %s23_s20 = ssub.s32 %s654_s15, %s715_s18  ;;  %p33_p0 = scmp.ne.s32.totalorder %s650_s14, %s646_s13 }
   0x8   : > { %p24_p1 = scmp.eq.s32.totalorder %s23_s20, 0  ;;  %p34_p2 = scmp.eq.s32.totalorder %s654_s15, 0 }
   0x9   : > { %p39_p3 = scmp.ne.s32.totalorder %s646_s13, %s642_s12  ;;  %p40_p4 = scmp.eq.s32.totalorder %s711_s16, 0 }
   0xa   : > { %s727_s21 = scalar_select %p24_p1, %s650_s14, %s26_s19  }
   0xb   : > { %p729_p5 = por %p34_p2, %p33_p0  ;;  %p733_p6 = por %p40_p4, %p39_p3 }
   0xc   : > { %p115_p7 = scmp.eq.s32.totalorder %s711_s16, 3  ;;  %p121_p8 = scmp.eq.s32.totalorder %s516_s17, 3 }
   0xd   : > { %p518_p11 = scmp.ge.s32.totalorder %s654_s15, 4 }
   0xe   : > { %p738_p9 = por %p115_p7, %p33_p0  ;;  %p742_p10 = por %p121_p8, %p39_p3 }
   0xf   : > { %137 = sbr.rel (%p518_p11) target bundleno = 33 (0x21), region = 16 }
  0x14   : > { %s141_s26 = sand.u32 1, %s650_s14   ;;  %s539_s27 = sshll.u32 %s654_s15, 9 }
  0x15   : > { %s519_s28 = sshll.u32 %s141_s26, 6  ;;  %s152_s4 = scalar_lea.hbm %s874_s0, %s539_s27 }
  0x16   : > { %s542_s5 = scalar_select %p729_p5, [#allocation0], [#allocation10] }
  0x17   : > { %s145_s6 = scalar_lea.vmem [#allocation2], %s519_s28  ;;  %s656_s9 = smov 2048  }
  0x18   : > { %s165_s7 = sshll.u32 %s145_s6, 4  ;;  %s157_s8 = sld [smem:[%s542_s5]]   ;;  %s166_s7 = int_to_ptr.vmem [resolvable:$true] %s165_s7 }
  0x19   : > { %543 = sst [smem:[#allocation7]] (%p729_p5), %s656_s9  ;;  %s657_s10 = smov 512  }
  0x1a   : > { %544 = sst [smem:[#allocation7 + $0x1]] (%p729_p5), %s657_s10  ;;  %s658_s11 = smov 2  }
  0x1b   : > { %545 = sst [smem:[#allocation7 + $0x2]] (%p729_p5), %s658_s11  ;;  %s659_s17 = smov 256  }
  0x1c   : > { %546 = sst [smem:[#allocation7 + $0x3]] (%p729_p5), %s659_s17  ;;  %s660_s20 = smov 16  }
  0x1d   : > { %547 = sst [smem:[#allocation7 + $0x4]] (%p729_p5), %s659_s17  ;;  %s142_s28 = scalar_lea.sflag [#allocation3], %s141_s26 }
  0x1e   : > { %s523_s19 = sshll.u32 %s157_s8, 26  ;;  %548 = sst [smem:[#allocation7 + $0x5]] (%p729_p5), %s660_s20 }
  0x1f   : > { %s524_s27 = sadd.s32 134217728, %s523_s19  ;;  %s661_s29 = smov 131072  }
  0x20   : > { %549 = dma.general (%p729_p5), %s152_s4, 1024, %s166_s7, %s142_s28, %s661_s29, [#allocation7], %s524_s27, 0  }
  0x21 PF: > { %p525_p12 = scmp.ge.s32.totalorder %s654_s15, 1  ;;  %p204_p13 = scmp.lt.s32.totalorder %s654_s15, 5 }
  0x23   : > { %p205_p0 = pnand %p525_p12, %p204_p13 }
  0x24   : > { %s771_s30 = sand.u32 (!%p205_p0), 1, %s646_s13  }
  0x25   : > { %208 = sbr.rel (%p205_p0) target bundleno = 370 (0x172), region = 32  ;;  %s526_s5 = sshll.u32 (!%p205_p0), %s771_s30, 6 }
  0x26   : > { %s211_s6 = scalar_lea.sflag (!%p205_p0), [#allocation3], %s771_s30  ;;  %s214_s26 = scalar_lea.vmem (!%p205_p0), [#allocation2], %s526_s5 }
  0x2a   : > { %633 = dma.done.wait (%p733_p6), %s211_s6, 1024  }
  0x2b   : > { %635 = vsyncadd (%p733_p6), %s211_s6, 4294966272  ;;  %v781_v0 = vld [vmem:[%s214_s26 + $0x20] sm:$0xff]  ;;  %v783_v1 = vld [vmem:[%s214_s26 + $0x28] sm:$0xff]  ;;  %v662_v24 = vmov 0   ;;  %s528_s22 = sshll.u32 %s711_s16, 1  ;;  %s246_s17 = scalar_lea.vmem [#allocation5], %s526_s5 }
  0x2c   : > { %v785_v2 = vld [vmem:[%s214_s26] sm:$0xff]  ;;  %v275_v3 = vadd.f32 %v783_v1, %v781_v0  ;;  %v789_v4 = vld [vmem:[%s214_s26 + $0x8] sm:$0xff]  ;;  %v791_v5 = vld [vmem:[%s214_s26 + $0x30] sm:$0xff]  ;;  %v287_v20 = vmul.f32 %v781_v0, %v781_v0  ;;  %v288_v21 = vmul.f32 %v783_v1, %v783_v1  ;;  %611 = vset.pattern.permute.xlu1 %v662_v24  ;;  %610 = vset.pattern.permute.xlu0 %v662_v24  ;;  %p249_p1 = scmp.lt.s32.totalorder %s528_s22, 7  ;;  %s382_s19 = scalar_lea.sflag [#allocation4], %s771_s30 }
  0x2d   : > { %v793_v6 = vld [vmem:[%s214_s26 + $0x38] sm:$0xff]  ;;  %v269_v7 = vadd.f32 %v789_v4, %v785_v2  ;;  %v797_v8 = vld [vmem:[%s214_s26 + $0x10] sm:$0xff]  ;;  %v283_v14 = vmul.f32 %v785_v2, %v785_v2  ;;  %v284_v15 = vmul.f32 %v789_v4, %v789_v4  ;;  %v289_v17 = vmul.f32 %v791_v5, %v791_v5 }
  0x2e   : > { %v799_v9 = vld [vmem:[%s214_s26 + $0x18] sm:$0xff]  ;;  %276 = vadd.xlane.f32.xlu1 %v275_v3  ;;  %v278_v10 = vadd.f32 %v793_v6, %v791_v5  ;;  %v285_v11 = vmul.f32 %v797_v8, %v797_v8  ;;  %v290_v18 = vmul.f32 %v793_v6, %v793_v6  ;;  %v297_v23 = vadd.f32 %v288_v21, %v287_v20  ;;  %s887_s22 = smov (!%p249_p1, %s528_s22), 7 }
  0x2f   : > { %v286_v12 = vmul.f32 %v799_v9, %v799_v9  ;;  %270 = vadd.xlane.f32.xlu0 %v269_v7  ;;  %v272_v13 = vadd.f32 %v799_v9, %v797_v8  ;;  %v291_v19 = vadd.f32 %v284_v15, %v283_v14  ;;  %s529_s23 = sshll.u32 %s887_s22, 3 }
  0x30   : > { %v300_v22 = vadd.f32 %v290_v18, %v289_v17  ;;  %s252_s8 = scalar_lea.vmem %s875_s1, %s529_s23  ;;  %s258_s11 = scalar_lea.vmem %s876_s2, %s529_s23 }
  0x31   : > { %v294_v16 = vadd.f32 %v286_v12, %v285_v11  ;;  %v320_v49 = vld [vmem:[%s252_s8 + $0x8] sm:$0xff]  ;;  %v319_v50 = vld [vmem:[%s252_s8] sm:$0xff] }
  0x32   : > { %279 = vadd.xlane.f32.xlu1 %v278_v10  ;;  %v323_v55 = vld [vmem:[%s258_s11] sm:$0xff]  ;;  %v324_v59 = vld [vmem:[%s258_s11 + $0x8] sm:$0xff] }
  0x33   : > { %273 = vadd.xlane.f32.xlu0 %v272_v13 }
  0x36   : > { %295 = vadd.xlane.f32.xlu1 %v294_v16 }
  0x37   : > { %292 = vadd.xlane.f32.xlu0 %v291_v19 }
  0x3a   : > { %301 = vadd.xlane.f32.xlu1 %v300_v22 }
  0x3b   : > { %298 = vadd.xlane.f32.xlu0 %v297_v23 }
  0xb7   : > { %v277_v25 = vpop.xlane.xlu1 %276 }
  0xb8   : > { %v271_v26 = vpop.xlane.xlu0 %270 }
  0xb9   : > { %v281_v30 = vadd.f32 %v277_v25, %v271_v26 }
  0xbb   : > { %v280_v27 = vpop.xlane.xlu1 %279  ;;  %v305_v34 = vmul.f32 0.001953125, %v281_v30 }
  0xbc   : > { %v274_v28 = vpop.xlane.xlu0 %273 }
  0xbd   : > { %v282_v29 = vadd.f32 %v280_v27, %v274_v28  ;;  %v309_v41 = vmul.f32 %v305_v34, %v305_v34 }
  0xbf   : > { %v296_v31 = vpop.xlane.xlu1 %295  ;;  %v306_v33 = vmul.f32 0.001953125, %v282_v29 }
  0xc0   : > { %v293_v32 = vpop.xlane.xlu0 %292 }
  0xc1   : > { %v310_v39 = vmul.f32 %v306_v33, %v306_v33 }
  0xc3   : > { %v302_v35 = vpop.xlane.xlu1 %301 }
  0xc4   : > { %v304_v36 = vadd.f32 %v302_v35, %v296_v31  ;;  %v299_v37 = vpop.xlane.xlu0 %298 }
  0xc5   : > { %v303_v38 = vadd.f32 %v299_v37, %v293_v32 }
  0xc6   : > { %v308_v40 = vmul.f32 0.001953125, %v304_v36 }
  0xc7   : > { %v307_v42 = vmul.f32 0.001953125, %v303_v38 }
  0xc8   : > { %v312_v43 = vsub.f32 %v308_v40, %v310_v39 }
  0xc9   : > { %v311_v44 = vsub.f32 %v307_v42, %v309_v41 }
  0xca   : > { %v314_v45 = vmax.f32 %v312_v43, 0.0 }
  0xcb   : > { %v313_v46 = vmax.f32 %v311_v44, 0.0 }
  0xcc   : > { %v316_v47 = vadd.f32 0.001, %v314_v45 }
  0xcd   : > { %v315_v48 = vadd.f32 0.001, %v313_v46 }
  0xce   : > { %612 = vrsqrt.f32 %v316_v47 }
  0xcf   : > { %614 = vrsqrt.f32 %v315_v48 }
  0xdb   : > { %v613_v51 = vpop.eup %612 }
  0xdc   : > { %v615_v52 = vpop.eup %614  ;;  %v322_v53 = vmul.f32 %v613_v51, %v320_v49 }
  0xdd   : > { %v321_v54 = vmul.f32 %v615_v52, %v319_v50 }
  0xde   : > { %336 = vperm.xlu1 %611, %v322_v53   ;;  %v326_v58 = vmul.f32 %v322_v53, %v306_v33 }
  0xdf   : > { %331 = vperm.xlu0 %610, %v321_v54   ;;  %v325_v56 = vmul.f32 %v321_v54, %v305_v34 }
  0xe0   : > { %v328_v60 = vsub.f32 %v324_v59, %v326_v58 }
  0xe1   : > { %v327_v57 = vsub.f32 %v323_v55, %v325_v56 }
  0xe3   : > { %349 = vperm.xlu1 %611, %v327_v57  }
  0xe7   : > { %354 = vperm.xlu1 %611, %v328_v60  }
 0x159   : > { %v337_v61 = vpop.permute.xlu1 %336 }
 0x15a   : > { %v332_v62 = vpop.permute.xlu0 %331  ;;  %v341_v16 = vmul.f32 %v337_v61, %v797_v8  ;;  %v342_v17 = vmul.f32 %v337_v61, %v799_v9  ;;  %v345_v18 = vmul.f32 %v337_v61, %v791_v5 }
 0x15b   : > { %v339_v63 = vmul.f32 %v332_v62, %v785_v2  ;;  %v340_v3 = vmul.f32 %v332_v62, %v789_v4  ;;  %v343_v7 = vmul.f32 %v332_v62, %v781_v0  ;;  %v344_v10 = vmul.f32 %v332_v62, %v783_v1 }
 0x15c   : > { %v346_v2 = vmul.f32 %v337_v61, %v793_v6 }
 0x15e   : > { %v350_v11 = vpop.permute.xlu1 %349 }
 0x15f   : > { %v357_v12 = vadd.f32 %v350_v11, %v339_v63  ;;  %v358_v13 = vadd.f32 %v350_v11, %v340_v3  ;;  %v361_v14 = vadd.f32 %v350_v11, %v343_v7  ;;  %v362_v15 = vadd.f32 %v350_v11, %v344_v10 }
 0x161   : > { %v365_v19 = vmax.f32 %v357_v12, 0.0  ;;  %v366_v4 = vmax.f32 %v358_v13, 0.0  ;;  %v369_v20 = vmax.f32 %v361_v14, 0.0  ;;  %v370_v0 = vmax.f32 %v362_v15, 0.0 }
 0x162   : > { %v355_v21 = vpop.permute.xlu1 %354 }
 0x163   : > { %373 = vst [vmem:[%s246_s17] sm:$0xff] %v365_v19  ;;  %374 = vst [vmem:[%s246_s17 + $0x8] sm:$0xff] %v366_v4  ;;  %v359_v1 = vadd.f32 %v355_v21, %v341_v16  ;;  %v360_v8 = vadd.f32 %v355_v21, %v342_v17  ;;  %v363_v22 = vadd.f32 %v355_v21, %v345_v18 }
 0x164   : > { %377 = vst [vmem:[%s246_s17 + $0x20] sm:$0xff] %v369_v20  ;;  %378 = vst [vmem:[%s246_s17 + $0x28] sm:$0xff] %v370_v0  ;;  %v364_v9 = vadd.f32 %v355_v21, %v346_v2 }
 0x165   : > { %v367_v23 = vmax.f32 %v359_v1, 0.0  ;;  %v368_v5 = vmax.f32 %v360_v8, 0.0  ;;  %v371_v24 = vmax.f32 %v363_v22, 0.0 }
 0x166   : > { %v372_v6 = vmax.f32 %v364_v9, 0.0 }
 0x167   : > { %375 = vst [vmem:[%s246_s17 + $0x10] sm:$0xff] %v367_v23  ;;  %376 = vst [vmem:[%s246_s17 + $0x18] sm:$0xff] %v368_v5 }
 0x168   : > { %379 = vst [vmem:[%s246_s17 + $0x30] sm:$0xff] %v371_v24  ;;  %380 = vst [vmem:[%s246_s17 + $0x38] sm:$0xff] %v372_v6 }
 0x169   : > { %s541_s20 = sshll.u32 %s711_s16, 9  ;;  %s406_s27 = sshll.u32 %s246_s17, 4  ;;  %s407_s27 = int_to_ptr.vmem [resolvable:$true] %s406_s27 }
 0x16a   : > { %s395_s5 = scalar_lea.hbm %s877_s3, %s541_s20  ;;  %s663_s6 = smov 512  }
 0x16b   : > { %551 = sst [smem:[#allocation9]] (%p738_p9), %s663_s6  ;;  %s664_s26 = smov 2048  }
 0x16c   : > { %552 = sst [smem:[#allocation9 + $0x1]] (%p738_p9), %s664_s26  ;;  %s665_s30 = smov 2  }
 0x16d   : > { %553 = sst [smem:[#allocation9 + $0x2]] (%p738_p9), %s665_s30  ;;  %s666_s22 = smov 256  }
 0x16e   : > { %554 = sst [smem:[#allocation9 + $0x3]] (%p738_p9), %s666_s22  ;;  %s667_s16 = smov 16  }
 0x16f   : > { %555 = sst [smem:[#allocation9 + $0x4]] (%p738_p9), %s666_s22  ;;  %s668_s23 = smov 131072  }
 0x170   : > { %556 = sst [smem:[#allocation9 + $0x5]] (%p738_p9), %s667_s16  ;;  %s669_s4 = smov 0  }
 0x171   : > { %557 = dma.general (%p738_p9), %s407_s27, 1024, %s395_s5, %s382_s19, %s668_s23, [#allocation9], %s669_s4, 0  }
 0x172 PF: > { %p563_p2 = scmp.ge.s32.totalorder %s654_s15, 2  ;;  %s434_s7 = sand.u32 1, %s642_s12  }
 0x173   : > { %s435_s8 = scalar_lea.sflag [#allocation4], %s434_s7 }
 0x174   : > { %p560_p3 = pnand %p563_p2, %p742_p10 }
 0x176   : > { %p561_p4 = pneg %p560_p3 }
 0x178   : > { %637 = dma.done.wait (%p561_p4), %s435_s8, 1024  }
 0x179   : > { %639 = vsyncadd (%p561_p4), %s435_s8, 4294966272  ;;  %p16_p5 = scmp.ge.s32.totalorder %s715_s18, 6   ;;  %s882_s12 = smov %s646_s13 }
 0x17a   : > { %s883_s13 = smov %s650_s14  ;;  %s884_s14 = smov %s727_s21 }
 0x17b   : > { %s885_s15 = smov %s715_s18  ;;  %18 = sbr.rel (!%p16_p5) target bundleno = 5 (0x5), region = 93 }
 0x180   :  { %440 = vsyncpa [#allocation3], 1 }
 0x181   :  { %442 = vsyncpa [#allocation3 + $0x1], 1 }
 0x182   :  { %443 = vsyncpa [#allocation4], 1 }
 0x183   :  { %445 = vsyncpa [#allocation4 + $0x1], 1 }

</bundles_post_ra>
